<compile_context>
chip_gen: v7x
topology: tpu7x:2x2x1
jax: 0.10.0
libtpu: 0.0.40
codegen_flags: <defaults>
</compile_context>

<pallas_src>
import numpy as np
import jax
import jax.numpy as jnp
from jax.experimental import pallas as pl
from jax.experimental.pallas import tpu as pltpu  # noqa: F401  (TPU backend)

# --- module hyperparameters (from the PyTorch script) ---
block_size = 8
n_embd = 4
num_heads = 2
head_size = 2          # head_size * num_heads == n_embd


def mha_kernel(x_ref, wqkv_ref, wp_ref, bp_ref, bias_ref, o_ref):
    """Single no-grid invocation over the whole (tiny) problem.

    x_ref    : (B, T, C)       activations
    wqkv_ref : (C, 3*H*hs)     fused [Q | K | V] projection, head-major columns
    wp_ref   : (H*hs, n_embd)  output projection weight
    bp_ref   : (1, n_embd)     output projection bias
    bias_ref : (T, T)          precomputed causal additive bias (0 / -1e30), f32
    o_ref    : (B, T, n_embd)
    """
    x = x_ref[...]                                           # (B, T, C)
    H, hs = num_heads, head_size
    scale = 1.0 / (hs ** 0.5)

    # One fused QKV projection: (B, T, C) @ (C, 3*H*hs) -> (B, T, 3*H*hs)
    qkv = jnp.dot(x, wqkv_ref[...], preferred_element_type=jnp.float32)
    bias = bias_ref[...]                                     # (T, T), pinned f32

    ctxs = []
    for h in range(H):                                       # static, tiny head count
        q = qkv[:, :, h * hs:(h + 1) * hs]                            # (B, T, hs)
        k = qkv[:, :, (H + h) * hs:(H + h + 1) * hs]                  # (B, T, hs)
        v = qkv[:, :, (2 * H + h) * hs:(2 * H + h + 1) * hs]          # (B, T, hs)

        # Contract hs of both operands directly (no .T / XLU relayout), batched
        # over B: scores stay (B, T, T) — only B*T^2 work and memory.
        wei = jnp.einsum('bqd,bkd->bqk', q, k,
                         preferred_element_type=jnp.float32) * scale  # (B, T, T)
        wei = wei + bias                                               # (T,T) broadcast

        # numerically-stable softmax along the last axis (exact divide: the EUP
        # is nowhere near saturated at this size, approx buys nothing)
        m = jnp.max(wei, axis=-1, keepdims=True)
        e = jnp.exp(wei - m)
        s = jnp.sum(e, axis=-1, keepdims=True)
        p = e / s
        # attention dropout is identity in eval mode

        ctxs.append(jnp.einsum('bqk,bkd->bqd', p, v,
                               preferred_element_type=jnp.float32))    # (B, T, hs)

    # Lane-concatenate the head contexts (they share one vreg) and apply the
    # output projection with a single matmul + bias add (== concat-then-project).
    ctx = jnp.concatenate(ctxs, axis=-1)                               # (B, T, H*hs)
    out = jnp.dot(ctx, wp_ref[...],
                  preferred_element_type=jnp.float32) + bp_ref[...]    # (B, T, n_embd)
    # output dropout is identity in eval mode
    o_ref[...] = out.astype(o_ref.dtype)


def prepare_params(wq, wk, wv):
    """One-time parameter prep (hoisted out of the per-call hot path).

    wq/wk/wv: (H, C, hs) -> fused (C, 3*H*hs) weight, head-major within each of the
    Q/K/V column groups; also builds the (T, T) causal additive bias as a constant.
    """
    C = wq.shape[1]

    def to_cols(w):                                  # (H, C, hs) -> (C, H*hs)
        return jnp.transpose(w, (1, 0, 2)).reshape(C, num_heads * head_size)

    wqkv = jnp.concatenate([to_cols(wq), to_cols(wk), to_cols(wv)], axis=1)
    causal_bias = jnp.asarray(
        np.where(np.tril(np.ones((block_size, block_size), dtype=bool)),
                 0.0, -1e30).astype(np.float32))
    return wqkv, causal_bias


def multi_head_attention(x, wqkv, wp, bp, causal_bias):
    """x: (B, T, C); wqkv: (C, 3*H*hs); wp: (H*hs, n_embd); bp: (1, n_embd)."""
    B, T, C = x.shape
    return pl.pallas_call(
        mha_kernel,
        out_shape=jax.ShapeDtypeStruct((B, T, n_embd), x.dtype),
        # No grid / BlockSpecs: whole arrays land in VMEM as single blocks, so
        # there is exactly one invocation and one whole-ref store. At this size
        # the kernel is launch/overhead bound, not compute bound.
        # TODO(synk): add a "parallel" batch/q-tile grid axis for v7x at larger shapes.
    )(x, wqkv, wp, bp, causal_bias)


def reference_mha(x, wq, wk, wv, wp, bp):
    """Pure-JAX reference matching the PyTorch forward (eval mode)."""
    B, T, C = x.shape
    scale = 1.0 / (head_size ** 0.5)
    mask = jnp.tril(jnp.ones((T, T), dtype=bool))
    outs = []
    for h in range(num_heads):
        q = x @ wq[h]
        k = x @ wk[h]
        v = x @ wv[h]
        wei = (q @ jnp.swapaxes(k, -2, -1)) * scale
        wei = jnp.where(mask, wei, -jnp.inf)
        wei = jax.nn.softmax(wei, axis=-1)
        outs.append(wei @ v)
    cat = jnp.concatenate(outs, axis=-1)
    return cat @ wp + bp[0]


if __name__ == "__main__":
    key = jax.random.PRNGKey(0)
    k_x, k_q, k_k, k_v, k_p, k_b = jax.random.split(key, 6)

    B, T = 2, block_size
    x = jax.random.normal(k_x, (B, T, n_embd), dtype=jnp.float32)

    # deterministic synthetic parameters (shapes implied by the module __init__)
    wq = 0.1 * jax.random.normal(k_q, (num_heads, n_embd, head_size), dtype=jnp.float32)
    wk = 0.1 * jax.random.normal(k_k, (num_heads, n_embd, head_size), dtype=jnp.float32)
    wv = 0.1 * jax.random.normal(k_v, (num_heads, n_embd, head_size), dtype=jnp.float32)
    wp = 0.1 * jax.random.normal(k_p, (num_heads * head_size, n_embd), dtype=jnp.float32)
    bp = 0.1 * jax.random.normal(k_b, (1, n_embd), dtype=jnp.float32)

    # one-time weight fusion + causal-mask precompute (kept out of the hot path)
    wqkv, causal_bias = prepare_params(wq, wk, wv)

    out = multi_head_attention(x, wqkv, wp, bp, causal_bias)
    out = jax.block_until_ready(out)

    ref = reference_mha(x, wq, wk, wv, wp, bp)
    assert out.shape == (B, T, n_embd)
    # exact divide in the softmax -> tight tolerance is fine
    assert jnp.allclose(out, ref, atol=1e-5, rtol=1e-5), "mismatch vs reference"

    print("KERNEL_OK")
</pallas_src>

<mosaic_0001>
module attributes {stable_mosaic.version = 11 : i64} {
  func.func @mha_kernel(%arg0: memref<2x8x4xf32, #tpu.memory_space<vmem>>, %arg1: memref<4x12xf32, #tpu.memory_space<vmem>>, %arg2: memref<4x4xf32, #tpu.memory_space<vmem>>, %arg3: memref<1x4xf32, #tpu.memory_space<vmem>>, %arg4: memref<8x8xf32, #tpu.memory_space<vmem>>, %arg5: memref<2x8x4xf32, #tpu.memory_space<vmem>>) attributes {dimension_semantics = [], scalar_prefetch = 0 : i64, scratch_operands = 0 : i64, tpu.core_type = #tpu.core_type<tc>} {
    %c0 = arith.constant 0 : index
    %c0_0 = arith.constant 0 : index
    %c0_1 = arith.constant 0 : index
    %0 = vector.load %arg0[%c0, %c0_0, %c0_1] : memref<2x8x4xf32, #tpu.memory_space<vmem>>, vector<2x8x4xf32>
    %c0_2 = arith.constant 0 : index
    %c0_3 = arith.constant 0 : index
    %1 = vector.load %arg1[%c0_2, %c0_3] : memref<4x12xf32, #tpu.memory_space<vmem>>, vector<4x12xf32>
    %cst = arith.constant dense<0.000000e+00> : vector<2x8x12xf32>
    %2 = tpu.matmul %0, %1, %cst {dimension_numbers = #tpu.dot_dimension_numbers<[2], [0], [0, 1], [1], [0, 0, 0, 1, 1, 1], [], []>} : vector<2x8x4xf32>, vector<4x12xf32>, vector<2x8x12xf32> -> vector<2x8x12xf32>
    %c0_4 = arith.constant 0 : index
    %c0_5 = arith.constant 0 : index
    %3 = vector.load %arg4[%c0_4, %c0_5] : memref<8x8xf32, #tpu.memory_space<vmem>>, vector<8x8xf32>
    %4 = vector.extract_strided_slice %2 {offsets = [0, 0, 0], sizes = [2, 8, 2], strides = [1, 1, 1]} : vector<2x8x12xf32> to vector<2x8x2xf32>
    %5 = vector.extract_strided_slice %2 {offsets = [0, 0, 4], sizes = [2, 8, 2], strides = [1, 1, 1]} : vector<2x8x12xf32> to vector<2x8x2xf32>
    %6 = vector.extract_strided_slice %2 {offsets = [0, 0, 8], sizes = [2, 8, 2], strides = [1, 1, 1]} : vector<2x8x12xf32> to vector<2x8x2xf32>
    "tpu.trace_start"() <{level = 10 : i32, message = "bqd,bkd->bqk"}> : () -> ()
    %cst_6 = arith.constant dense<0.000000e+00> : vector<2x8x8xf32>
    %7 = tpu.matmul %4, %5, %cst_6 {dimension_numbers = #tpu.dot_dimension_numbers<[2], [2], [1], [1], [0, 0, 0, 1, 1, 1], [0], [0]>} : vector<2x8x2xf32>, vector<2x8x2xf32>, vector<2x8x8xf32> -> vector<2x8x8xf32>
    "tpu.trace_stop"() : () -> ()
    %cst_7 = arith.constant 0.707106769 : f32
    %8 = vector.broadcast %cst_7 : f32 to vector<2x8x8xf32>
    %9 = arith.mulf %7, %8 : vector<2x8x8xf32>
    %10 = vector.shape_cast %3 : vector<8x8xf32> to vector<1x8x8xf32>
    %11 = vector.broadcast %10 : vector<1x8x8xf32> to vector<2x8x8xf32>
    %12 = arith.addf %9, %11 : vector<2x8x8xf32>
    %cst_8 = arith.constant dense<0xFF800000> : vector<2x8xf32>
    %13 = vector.multi_reduction <maximumf>, %12, %cst_8 [2] : vector<2x8x8xf32> to vector<2x8xf32>
    %14 = vector.shape_cast %13 : vector<2x8xf32> to vector<2x8x1xf32>
    %15 = vector.broadcast %14 : vector<2x8x1xf32> to vector<2x8x8xf32>
    %16 = arith.subf %12, %15 : vector<2x8x8xf32>
    %17 = math.exp %16 : vector<2x8x8xf32>
    %cst_9 = arith.constant dense<0.000000e+00> : vector<2x8xf32>
    %18 = vector.multi_reduction <add>, %17, %cst_9 [2] : vector<2x8x8xf32> to vector<2x8xf32>
    %19 = vector.shape_cast %18 : vector<2x8xf32> to vector<2x8x1xf32>
    %20 = vector.broadcast %19 : vector<2x8x1xf32> to vector<2x8x8xf32>
    %21 = arith.divf %17, %20 : vector<2x8x8xf32>
    "tpu.trace_start"() <{level = 10 : i32, message = "bqk,bkd->bqd"}> : () -> ()
    %cst_10 = arith.constant dense<0.000000e+00> : vector<2x8x2xf32>
    %22 = tpu.matmul %21, %6, %cst_10 {dimension_numbers = #tpu.dot_dimension_numbers<[2], [1], [1], [2], [0, 0, 0, 1, 1, 2], [0], [0]>} : vector<2x8x8xf32>, vector<2x8x2xf32>, vector<2x8x2xf32> -> vector<2x8x2xf32>
    "tpu.trace_stop"() : () -> ()
    %23 = vector.extract_strided_slice %2 {offsets = [0, 0, 2], sizes = [2, 8, 2], strides = [1, 1, 1]} : vector<2x8x12xf32> to vector<2x8x2xf32>
    %24 = vector.extract_strided_slice %2 {offsets = [0, 0, 6], sizes = [2, 8, 2], strides = [1, 1, 1]} : vector<2x8x12xf32> to vector<2x8x2xf32>
    %25 = vector.extract_strided_slice %2 {offsets = [0, 0, 10], sizes = [2, 8, 2], strides = [1, 1, 1]} : vector<2x8x12xf32> to vector<2x8x2xf32>
    "tpu.trace_start"() <{level = 10 : i32, message = "bqd,bkd->bqk"}> : () -> ()
    %cst_11 = arith.constant dense<0.000000e+00> : vector<2x8x8xf32>
    %26 = tpu.matmul %23, %24, %cst_11 {dimension_numbers = #tpu.dot_dimension_numbers<[2], [2], [1], [1], [0, 0, 0, 1, 1, 1], [0], [0]>} : vector<2x8x2xf32>, vector<2x8x2xf32>, vector<2x8x8xf32> -> vector<2x8x8xf32>
    "tpu.trace_stop"() : () -> ()
    %cst_12 = arith.constant 0.707106769 : f32
    %27 = vector.broadcast %cst_12 : f32 to vector<2x8x8xf32>
    %28 = arith.mulf %26, %27 : vector<2x8x8xf32>
    %29 = vector.shape_cast %3 : vector<8x8xf32> to vector<1x8x8xf32>
    %30 = vector.broadcast %29 : vector<1x8x8xf32> to vector<2x8x8xf32>
    %31 = arith.addf %28, %30 : vector<2x8x8xf32>
    %cst_13 = arith.constant dense<0xFF800000> : vector<2x8xf32>
    %32 = vector.multi_reduction <maximumf>, %31, %cst_13 [2] : vector<2x8x8xf32> to vector<2x8xf32>
    %33 = vector.shape_cast %32 : vector<2x8xf32> to vector<2x8x1xf32>
    %34 = vector.broadcast %33 : vector<2x8x1xf32> to vector<2x8x8xf32>
    %35 = arith.subf %31, %34 : vector<2x8x8xf32>
    %36 = math.exp %35 : vector<2x8x8xf32>
    %cst_14 = arith.constant dense<0.000000e+00> : vector<2x8xf32>
    %37 = vector.multi_reduction <add>, %36, %cst_14 [2] : vector<2x8x8xf32> to vector<2x8xf32>
    %38 = vector.shape_cast %37 : vector<2x8xf32> to vector<2x8x1xf32>
    %39 = vector.broadcast %38 : vector<2x8x1xf32> to vector<2x8x8xf32>
    %40 = arith.divf %36, %39 : vector<2x8x8xf32>
    "tpu.trace_start"() <{level = 10 : i32, message = "bqk,bkd->bqd"}> : () -> ()
    %cst_15 = arith.constant dense<0.000000e+00> : vector<2x8x2xf32>
    %41 = tpu.matmul %40, %25, %cst_15 {dimension_numbers = #tpu.dot_dimension_numbers<[2], [1], [1], [2], [0, 0, 0, 1, 1, 2], [0], [0]>} : vector<2x8x8xf32>, vector<2x8x2xf32>, vector<2x8x2xf32> -> vector<2x8x2xf32>
    "tpu.trace_stop"() : () -> ()
    %42 = tpu.concatenate %22, %41 in 2 : vector<2x8x2xf32>, vector<2x8x2xf32> -> vector<2x8x4xf32>
    %c0_16 = arith.constant 0 : index
    %c0_17 = arith.constant 0 : index
    %43 = vector.load %arg2[%c0_16, %c0_17] : memref<4x4xf32, #tpu.memory_space<vmem>>, vector<4x4xf32>
    %cst_18 = arith.constant dense<0.000000e+00> : vector<2x8x4xf32>
    %44 = tpu.matmul %42, %43, %cst_18 {dimension_numbers = #tpu.dot_dimension_numbers<[2], [0], [0, 1], [1], [0, 0, 0, 1, 1, 1], [], []>} : vector<2x8x4xf32>, vector<4x4xf32>, vector<2x8x4xf32> -> vector<2x8x4xf32>
    %c0_19 = arith.constant 0 : index
    %c0_20 = arith.constant 0 : index
    %45 = vector.load %arg3[%c0_19, %c0_20] : memref<1x4xf32, #tpu.memory_space<vmem>>, vector<1x4xf32>
    %46 = vector.shape_cast %45 : vector<1x4xf32> to vector<1x1x4xf32>
    %47 = vector.broadcast %46 : vector<1x1x4xf32> to vector<2x8x4xf32>
    %48 = arith.addf %44, %47 : vector<2x8x4xf32>
    %c0_21 = arith.constant 0 : index
    %c0_22 = arith.constant 0 : index
    %c0_23 = arith.constant 0 : index
    %49 = vector.load %arg5[%c0_21, %c0_22, %c0_23] : memref<2x8x4xf32, #tpu.memory_space<vmem>>, vector<2x8x4xf32>
    tpu.vector_store %arg5[%c0_21, %c0_22, %c0_23], %48 {strides = array<i32>} : memref<2x8x4xf32, #tpu.memory_space<vmem>>, vector<2x8x4xf32>,
    return
  }
}

</mosaic_0001>

<bundles_post_ra>
// kernel: tpu_custom_call.1
= control target key start
LH: loop header
LB: loop body
LE: loop exit
PB: predicated region body
PF: predicated region fallthrough
CT: control target
= control target key end

     0   :  { %vm30_vm0 = vcmask 1043456   ;;  %vm23_vm1 = vcmask 31744   ;;  %v1001_v3 = vmov 0.0   ;;  %vm1002_vm2 = vmmov 0   ;;  %s1004_s25 = smov 120   ;;  %s1006_s26 = smov 126   ;;  %s1141_s1 = inlined_call_operand.vmem [shape: f32[4,12], index: 1, kind: input, shape index: {}]   ;;  %s1142_s0 = inlined_call_operand.vmem [shape: f32[2,8,4], index: 0, kind: input, shape index: {}]   ;;  %s1143_s4 = inlined_call_operand.vmem [shape: f32[8,8], index: 4, kind: input, shape index: {}]   ;;  %s1144_s2 = inlined_call_operand.vmem [shape: f32[4,4], index: 2, kind: input, shape index: {}]   ;;  %s1145_s3 = inlined_call_operand.vmem [shape: f32[1,4], index: 3, kind: input, shape index: {}]   ;;  %s1146_s5 = inlined_call_operand.vmem [shape: f32[2,8,4], index: 5, kind: output, shape index: {}]  }
   0x1   :  { %v22_v0 = vld [vmem:[%s1141_s1] sm:$0xf]  ;;  %v21_v2 = vld [vmem:[%s1142_s0 + $0x8] sm:$0xff]  ;;  %932 = vmatprep.subr.mxu1 %v1001_v3  ;;  %934 = vmatprep.mubr.msk.f32.mxu1 %vm1002_vm2, %v1001_v3  ;;  %vm113_vm3 = vcmask 15360   ;;  %vm269_vm4 = vcmask 64512   ;;  %s1007_s27 = smov 118  }
   0x2   :  { %v20_v1 = vld [vmem:[%s1142_s0] sm:$0xff]  ;;  %927 = vmatprep.subr.msk.mxu0 %vm30_vm0, %v22_v0  ;;  %s1003_s0 = smov 124   ;;  %s1008_s30 = smov 2  }
   0x3   :  { %929 = vmatprep.mubr.msk.f32.mxu0 %vm23_vm1, %v20_v1  ;;  %928 = vmatpush3.msk.msra.mxu0 %vm30_vm0, %v22_v0  ;;  %v1079_v9 = vld [vmem:[%s1143_s4] sm:$0xff]  ;;  %s1005_s4 = smov 122  }
   0x4   :  { %930 = vmatmul.mubr.msk.f32.vlgmr.msra.gmra.mrb[0].mxu0 %vm23_vm1, %v21_v2  ;;  %937 = vmatprep.subr.mxu0 %v1001_v3 }
   0x5   :  { %939 = vmatprep.mubr.msk.f32.mxu0 %vm1002_vm2, %v1001_v3 }
  0xd7   :  { %v1058_v4 = vpop.f32.mrb[0].mxu0 }
  0xd8   :  { %v1060_v5 = vpop.f32.mrb[1].mxu0 }
  0xd9   :  { %111 = vrot.lane.b32.xlu0 %v1060_v5, %s1003_s0 }
  0xdd   :  { %189 = vrot.lane.b32.xlu0 %v1058_v4, %s1003_s0 }
 0x14b   :  { %v112_v6 = vpop.permute.xlu0 %111 }
 0x14c   :  { %933 = vmatpush3.xpose.msk.msra.mxu1 %vm113_vm3, %v112_v6 }
 0x14d   :  { %942 = vmatprep.subr.mxu1 %v1001_v3 }
 0x14f   :  { %935 = vmatmul.mubr.msk.f32.vlgmr.msra.gmra.mrb[0].mxu1 %vm113_vm3, %v1060_v5  ;;  %v190_v7 = vpop.permute.xlu0 %189 }
 0x150   :  { %938 = vmatpush3.xpose.msk.msra.mxu0 %vm113_vm3, %v190_v7  ;;  %944 = vmatprep.mubr.msk.f32.mxu1 %vm1002_vm2, %v1001_v3 }
 0x151   :  { %947 = vmatprep.subr.mxu0 %v1001_v3 }
 0x153   :  { %940 = vmatmul.mubr.msk.f32.vlgmr.msra.gmra.mrb[2].mxu0 %vm113_vm3, %v1058_v4 }
 0x154   :  { %949 = vmatprep.mubr.msk.f32.mxu0 %vm1002_vm2, %v1001_v3 }
 0x222   :  { %v184_v8 = vpop.f32.mrb[0].mxu1 }
 0x223   :  { %v265_v10 = vmul.f32 0.70710677, %v184_v8  ;;  %v936_v11 = vpop.f32.mrb[1].mxu1 }
 0x225   :  { %v267_v12 = vadd.f32 %v265_v10, %v1079_v9  ;;  %v788_v10 = vld [vmem:[%s1144_s2] sm:$0xf] }
 0x226   :  { %v261_v13 = vpop.f32.mrb[2].mxu0 }
 0x227   :  { %v266_v14 = vmul.f32 0.70710677, %v261_v13  ;;  %v941_v15 = vpop.f32.mrb[3].mxu0  ;;  %v270_v16 = vsel %vm269_vm4, %v267_v12, -inf }
 0x228   :  { %271 = vmax.xlane.f32.xlu1 %v270_v16 }
 0x229   :  { %v268_v17 = vadd.f32 %v266_v14, %v1079_v9 }
 0x22b   :  { %v273_v18 = vsel %vm269_vm4, %v268_v17, -inf }
 0x22c   :  { %274 = vmax.xlane.f32.xlu1 %v273_v18  ;;  %v901_v18 = vld [vmem:[%s1145_s3] ss:$0 sm:$0xff] }
 0x23d   :  { %292 = vrot.lane.b32.xlu1 %v1060_v5, %s1004_s25 }
 0x241   :  { %368 = vrot.lane.b32.xlu1 %v1058_v4, %s1004_s25 }
 0x245   :  { %446 = vrot.lane.b32.xlu1 %v1060_v5, %s1005_s4 }
 0x249   :  { %524 = vrot.lane.b32.xlu1 %v1058_v4, %s1005_s4 }
 0x2b5   :  { %v272_v19 = vpop.xlane.xlu1 %271 }
 0x2b6   :  { %v276_v20 = vsub.f32 %v267_v12, %v272_v19 }
 0x2b8   :  { %v278_v21 = vmul.f32 1.442695, %v276_v20 }
 0x2b9   :  { %v275_v22 = vpop.xlane.xlu1 %274 }
 0x2ba   :  { %985 = vpow2.f32 %v278_v21  ;;  %v277_v23 = vsub.f32 %v268_v17, %v275_v22 }
 0x2bc   :  { %v280_v24 = vmul.f32 1.442695, %v277_v23 }
 0x2bd   :  { %v293_v25 = vpop.permute.xlu1 %292 }
 0x2be   :  { %987 = vpow2.f32 %v280_v24  ;;  %943 = vmatpush3.msra.mxu1 %v293_v25 }
 0x2bf   :  { %952 = vmatprep.subr.mxu1 %v1001_v3 }
 0x2c1   :  { %v369_v26 = vpop.permute.xlu1 %368 }
 0x2c2   :  { %948 = vmatpush3.msra.mxu0 %v369_v26 }
 0x2c3   :  { %957 = vmatprep.subr.mxu0 %v1001_v3 }
 0x2c4   :  { %v986_v27 = vpop.eup %985 }
 0x2c5   :  { %v282_v28 = vsel %vm269_vm4, %v986_v27, 0.0  ;;  %v447_v31 = vpop.permute.xlu1 %446 }
 0x2c6   :  { %283 = vadd.xlane.f32.xlu0 %v282_v28 }
 0x2c8   :  { %v988_v29 = vpop.eup %987 }
 0x2c9   :  { %v285_v30 = vsel %vm269_vm4, %v988_v29, 0.0  ;;  %v525_v32 = vpop.permute.xlu1 %524 }
 0x2ca   :  { %286 = vadd.xlane.f32.xlu1 %v285_v30 }
 0x2db   :  { %522 = vrot.lane.b32.xlu1 %v1058_v4, %s1006_s26 }
 0x2dc   :  { %444 = vrot.lane.b32.xlu0 %v1060_v5, %s1006_s26 }
 0x353   :  { %v284_v33 = vpop.xlane.xlu0 %283 }
 0x354   :  { %989 = vrcp.f32 %v284_v33 }
 0x357   :  { %v287_v34 = vpop.xlane.xlu1 %286  ;;  %v445_v39 = vpop.permute.xlu0 %444 }
 0x358   :  { %991 = vrcp.f32 %v287_v34 }
 0x35b   :  { %v523_v40 = vpop.permute.xlu1 %522 }
 0x35e   :  { %v990_v35 = vpop.eup %989 }
 0x35f   :  { %v289_v36 = vmul.f32 %v990_v35, %v986_v27 }
 0x361   :  { %945 = vmatmul.mubr.msk.f32.vlgmr.msra.gmra.mrb[2].mxu1 %vm269_vm4, %v289_v36 }
 0x362   :  { %v992_v37 = vpop.eup %991  ;;  %953 = vmatpush3.xpose.msk.msra.mxu1 %vm113_vm3, %v447_v31  ;;  %954 = vmatprep.mubr.msk.f32.mxu1 %vm1002_vm2, %v1001_v3 }
 0x363   :  { %v291_v38 = vmul.f32 %v992_v37, %v988_v29  ;;  %962 = vmatprep.subr.mxu1 %v1001_v3 }
 0x365   :  { %950 = vmatmul.mubr.msk.f32.vlgmr.msra.gmra.mrb[4].mxu0 %vm269_vm4, %v291_v38  ;;  %955 = vmatmul.mubr.msk.f32.vlgmr.msra.gmra.mrb[4].mxu1 %vm113_vm3, %v445_v39 }
 0x366   :  { %958 = vmatpush3.xpose.msk.msra.mxu0 %vm113_vm3, %v525_v32  ;;  %959 = vmatprep.mubr.msk.f32.mxu0 %vm1002_vm2, %v1001_v3 }
 0x367   :  { %967 = vmatprep.subr.mxu0 %v1001_v3  ;;  %964 = vmatprep.mubr.msk.f32.mxu1 %vm1002_vm2, %v1001_v3 }
 0x369   :  { %960 = vmatmul.mubr.msk.f32.vlgmr.msra.gmra.mrb[6].mxu0 %vm113_vm3, %v523_v40 }
 0x36a   :  { %969 = vmatprep.mubr.msk.f32.mxu0 %vm1002_vm2, %v1001_v3 }
 0x434   :  { %v364_v41 = vpop.f32.mrb[2].mxu1 }
 0x435   :  { %v946_v42 = vpop.f32.mrb[3].mxu1 }
 0x438   :  { %v440_v43 = vpop.f32.mrb[4].mxu0  ;;  %v518_v44 = vpop.f32.mrb[4].mxu1 }
 0x439   :  { %v600_v45 = vmul.f32 0.70710677, %v518_v44  ;;  %v951_v46 = vpop.f32.mrb[5].mxu0  ;;  %v956_v47 = vpop.f32.mrb[5].mxu1 }
 0x43b   :  { %v602_v48 = vadd.f32 %v600_v45, %v1079_v9 }
 0x43c   :  { %v596_v49 = vpop.f32.mrb[6].mxu0 }
 0x43d   :  { %v601_v50 = vmul.f32 0.70710677, %v596_v49  ;;  %v961_v51 = vpop.f32.mrb[7].mxu0  ;;  %v604_v52 = vsel %vm269_vm4, %v602_v48, -inf }
 0x43e   :  { %605 = vmax.xlane.f32.xlu1 %v604_v52 }
 0x43f   :  { %v603_v53 = vadd.f32 %v601_v50, %v1079_v9 }
 0x441   :  { %v607_v54 = vsel %vm269_vm4, %v603_v53, -inf }
 0x442   :  { %608 = vmax.xlane.f32.xlu0 %v607_v54 }
 0x458   :  { %702 = vrot.lane.b32.xlu0 %v1058_v4, %s1007_s27 }
 0x4cb   :  { %v606_v55 = vpop.xlane.xlu1 %605 }
 0x4cc   :  { %v610_v56 = vsub.f32 %v602_v48, %v606_v55 }
 0x4ce   :  { %v612_v59 = vmul.f32 1.442695, %v610_v56 }
 0x4cf   :  { %v609_v57 = vpop.xlane.xlu0 %608 }
 0x4d0   :  { %v611_v58 = vsub.f32 %v603_v53, %v609_v57 }
 0x4d2   :  { %v614_v60 = vmul.f32 1.442695, %v611_v58 }
 0x4d3   :  { %v703_v61 = vpop.permute.xlu0 %702 }
 0x4d4   :  { %993 = vpow2.f32 %v614_v60  ;;  %968 = vmatpush3.msra.mxu0 %v703_v61 }
 0x4d5   :  { %995 = vpow2.f32 %v612_v59 }
 0x4de   :  { %v994_v62 = vpop.eup %993 }
 0x4df   :  { %v619_v63 = vsel %vm269_vm4, %v994_v62, 0.0  ;;  %v996_v0 = vpop.eup %995 }
 0x4e0   :  { %620 = vadd.xlane.f32.xlu1 %v619_v63  ;;  %v616_v1 = vsel %vm269_vm4, %v996_v0, 0.0 }
 0x4e4   :  { %617 = vadd.xlane.f32.xlu1 %v616_v1 }
 0x4f5   :  { %626 = vrot.lane.b32.xlu1 %v1060_v5, %s1007_s27 }
 0x56d   :  { %v621_v2 = vpop.xlane.xlu1 %620 }
 0x56e   :  { %997 = vrcp.f32 %v621_v2 }
 0x571   :  { %v618_v3 = vpop.xlane.xlu1 %617 }
 0x572   :  { %999 = vrcp.f32 %v618_v3 }
 0x575   :  { %v627_v4 = vpop.permute.xlu1 %626 }
 0x576   :  { %963 = vmatpush3.msra.mxu1 %v627_v4 }
 0x577   :  { %972 = vmatprep.subr.msk.mxu1 %vm30_vm0, %v788_v10 }
 0x578   :  { %v998_v6 = vpop.eup %997 }
 0x579   :  { %v625_v7 = vmul.f32 %v998_v6, %v994_v62 }
 0x57b   :  { %970 = vmatmul.mubr.msk.f32.vlgmr.msra.gmra.mrb[8].mxu0 %vm269_vm4, %v625_v7 }
 0x57c   :  { %v1000_v8 = vpop.eup %999 }
 0x57d   :  { %v623_v9 = vmul.f32 %v1000_v8, %v996_v0 }
 0x57f   :  { %965 = vmatmul.mubr.msk.f32.vlgmr.msra.gmra.mrb[6].mxu1 %vm269_vm4, %v623_v9 }
 0x580   :  { %973 = vmatpush3.msk.msra.mxu1 %vm30_vm0, %v788_v10 }
 0x64e   :  { %v774_v5 = vpop.f32.mrb[8].mxu0 }
 0x64f   :  { %v971_v11 = vpop.f32.mrb[9].mxu0 }
 0x652   :  { %v698_v12 = vpop.f32.mrb[6].mxu1 }
 0x653   :  { %780 = vrot.lane.b32.xlu1 %v698_v12, %s1008_s30  ;;  %v966_v13 = vpop.f32.mrb[7].mxu1 }
 0x657   :  { %782 = vrot.lane.b32.xlu1 %v774_v5, %s1008_s30 }
 0x6c5   :  { %v781_v14 = vpop.permute.xlu1 %780 }
 0x6c6   :  { %v786_v15 = vsel %vm113_vm3, %v364_v41, %v781_v14 }
 0x6c7   :  { %974 = vmatprep.mubr.msk.f32.mxu1 %vm23_vm1, %v786_v15 }
 0x6c9   :  { %v783_v16 = vpop.permute.xlu1 %782 }
 0x6ca   :  { %v787_v17 = vsel %vm113_vm3, %v440_v43, %v783_v16 }
 0x6cb   :  { %975 = vmatmul.mubr.msk.f32.vlgmr.msra.gmra.mrb[8].mxu1 %vm23_vm1, %v787_v17 }
 0x79e   :  { %v976_v19 = vpop.f32.mrb[8].mxu1 }
 0x79f   :  { %v877_v20 = vadd.f32 %v976_v19, %v901_v18  ;;  %v871_v21 = vpop.f32.mrb[9].mxu1 }
 0x7a0   :  { %v872_v22 = vadd.f32 %v901_v18, %v871_v21 }
 0x7a1   :  { %881 = vst.msk [vmem:[%s1146_s5 + $0x8] sm:$0xff] %vm23_vm1, %v877_v20 }
 0x7a2   :  { %880 = vst.msk [vmem:[%s1146_s5] sm:$0xff] %vm23_vm1, %v872_v22 }

</bundles_post_ra>
